<compile_context>
chip_gen: v7x
topology: tpu7x:2x2x1
jax: 0.10.0
libtpu: 0.0.40
codegen_flags: <defaults>
</compile_context>

<pallas_src>
import functools

import jax
import jax.numpy as jnp
from jax import lax
from jax.experimental import pallas as pl
from jax.experimental.pallas import tpu as pltpu

LANES = 128       # output-channel lane padding (lane-dense stores)
TILE_ROWS = 128   # spatial output positions per grid step


def _round_up(x, m):
  return (x + m - 1) // m * m


# ----------------------------- Pallas kernel ------------------------------ #

def _matmul_bias_act_kernel(x_ref, w_ref, b_ref, a_ref, o_ref, *, apply_prelu):
  """One row-tile of a layer: deep-K MXU matmul + bias (+ PReLU), one store.

  x_ref: (TILE_ROWS, K_pad) bf16   im2col activation tile
  w_ref: (K_pad, LANES)     bf16   packed weights (zero-padded K / Cout)
  b_ref: (1, LANES)         f32    bias (zero-padded)
  a_ref: (1, LANES)         f32    PReLU slope (ignored if apply_prelu=False)
  o_ref: (TILE_ROWS, LANES) f32
  """
  y = jnp.dot(x_ref[...], w_ref[...], preferred_element_type=jnp.float32)
  y = y + b_ref[...]
  if apply_prelu:
    y = jnp.where(y >= 0.0, y, a_ref[...] * y)
  o_ref[...] = y


def conv3d_prelu(x_ndhwc, layer):
  """'Same'-style stride-1 3D conv + bias (+ PReLU) as lane-dense matmuls.

  x_ndhwc: (N, D, H, W, Cin) float32
  layer:   dict with packed weights (K_pad, 128) bf16, padded bias/alpha, meta.
  """
  n, d, h, wdim, cin = x_ndhwc.shape
  kd, kh, kw = layer["ksize"]
  pd, ph, pw = layer["pad"]
  cout = layer["cout"]
  w_packed = layer["w_packed"]                    # (K_pad, LANES) bf16
  k_pad = w_packed.shape[0]

  do, ho, wo = d, h, wdim                          # stride-1, 'same'-style pads
  xp = jnp.pad(x_ndhwc, ((0, 0), (pd, pd), (ph, ph), (pw, pw), (0, 0)))
  xp = xp.astype(jnp.bfloat16)

  # im2col (XLA glue): tap-major / channel-minor, matching w_packed row order.
  cols = []
  for a in range(kd):
    for b in range(kh):
      for c in range(kw):
        cols.append(xp[:, a:a + do, b:b + ho, c:c + wo, :])
  patches = jnp.stack(cols, axis=-2).reshape(n, do * ho * wo, kd * kh * kw * cin)

  l = do * ho * wo
  l_pad = _round_up(l, TILE_ROWS)
  patches = jnp.pad(
      patches, ((0, 0), (0, l_pad - l), (0, k_pad - patches.shape[-1])))

  kernel = functools.partial(_matmul_bias_act_kernel,
                             apply_prelu=layer["prelu"])

  out = pl.pallas_call(
      kernel,
      out_shape=jax.ShapeDtypeStruct((n, l_pad, LANES), jnp.float32),
      grid_spec=pltpu.PrefetchScalarGridSpec(
          num_scalar_prefetch=0,
          grid=(n, l_pad // TILE_ROWS),
          in_specs=[
              pl.BlockSpec((None, TILE_ROWS, k_pad), lambda b, r: (b, r, 0)),
              pl.BlockSpec((k_pad, LANES), lambda b, r: (0, 0)),
              pl.BlockSpec((1, LANES), lambda b, r: (0, 0)),
              pl.BlockSpec((1, LANES), lambda b, r: (0, 0)),
          ],
          out_specs=pl.BlockSpec((None, TILE_ROWS, LANES),
                                 lambda b, r: (b, r, 0)),
      ),
      compiler_params=pltpu.CompilerParams(
          dimension_semantics=("parallel", "parallel"),
          vmem_limit_bytes=32 * 1024 * 1024),
  )(patches, w_packed, layer["b_pad"], layer["a_pad"])

  # Strip padded rows / lanes and unflatten (pure glue).
  return out[:, :l, :cout].reshape(n, do, ho, wo, cout)


# ------------------------- parameters & packing ---------------------------- #

def _pack_layer(w, b, alpha, ksize, pad, prelu):
  """w: (Kvol, Cin, Cout) f32 -> lane-dense bf16 (K_pad, 128) packed weights."""
  kvol, cin, cout = w.shape
  k = kvol * cin
  k_pad = _round_up(k, LANES)
  w2 = w.reshape(k, cout)
  w_packed = jnp.zeros((k_pad, LANES), jnp.float32).at[:k, :cout].set(w2)
  w_packed = w_packed.astype(jnp.bfloat16)
  b_pad = jnp.zeros((1, LANES), jnp.float32).at[0, :cout].set(b)
  a_pad = jnp.zeros((1, LANES), jnp.float32).at[0, :cout].set(alpha)
  return dict(w=w, b=b, alpha=alpha, ksize=ksize, pad=pad, prelu=prelu,
              cout=cout, w_packed=w_packed, b_pad=b_pad, a_pad=a_pad)


def init_fsrcnn_params(key, scale_factor=1, num_channels=1, d=56, s=12, m=4):
  assert scale_factor == 1  # TODO(synk): scale_factor>1 not implemented
  cfg = [((5, 5, 5), (2, 2, 2), num_channels, d, True),
         ((1, 1, 1), (0, 0, 0), d, s, True)]
  cfg += [((3, 3, 3), (1, 1, 1), s, s, True)] * m
  cfg += [((1, 1, 1), (0, 0, 0), s, d, True)]

  layers = []
  keys = jax.random.split(key, len(cfg) + 1)
  for (ks, pad, cin, cout, prelu), k in zip(cfg, keys[:-1]):
    kvol = ks[0] * ks[1] * ks[2]
    kw_, kb_ = jax.random.split(k)
    wgt = jax.random.normal(kw_, (kvol, cin, cout), jnp.float32) / jnp.sqrt(kvol * cin)
    # Keep the bf16-rounded weights as the canonical parameters so the kernel
    # (bf16 matmul) and the f32 reference share bit-identical weights.
    wgt = wgt.astype(jnp.bfloat16).astype(jnp.float32)
    bias = jax.random.normal(kb_, (cout,), jnp.float32) * 0.01
    alpha = jnp.full((cout,), 0.25, jnp.float32)   # PyTorch PReLU default init
    layers.append(_pack_layer(wgt, bias, alpha, ks, pad, prelu))

  # last_part: ConvTranspose3d(d, num_channels, (9,5,5), stride=(1,1,1),
  # padding=(4,2,2), output_padding=(0,0,0)).  With stride 1 it equals a
  # Conv3d with the flipped kernel, swapped channel axes, padding k-1-p.
  kw_, kb_ = jax.random.split(keys[-1])
  wt = jax.random.normal(kw_, (d, num_channels, 9, 5, 5), jnp.float32) / jnp.sqrt(d * 9 * 5 * 5)
  bt = jax.random.normal(kb_, (num_channels,), jnp.float32) * 0.01
  w_eq = jnp.flip(wt, axis=(2, 3, 4)).transpose(2, 3, 4, 0, 1).reshape(9 * 5 * 5, d, num_channels)
  w_eq = w_eq.astype(jnp.bfloat16).astype(jnp.float32)
  layers.append(_pack_layer(w_eq, bt, jnp.zeros((num_channels,), jnp.float32),
                            (9, 5, 5), (4, 2, 2), False))
  return layers


def fsrcnn_forward(layers, x_ncdhw):
  x = jnp.transpose(x_ncdhw, (0, 2, 3, 4, 1)).astype(jnp.float32)  # NCDHW -> NDHWC
  for lyr in layers:
    x = conv3d_prelu(x, lyr)
  return jnp.transpose(x, (0, 4, 1, 2, 3))                          # back to NCDHW


# --------------------------- pure-JAX reference ---------------------------- #

def _conv3d_ref(x, w, b, alpha, ksize, pad, prelu):
  kd, kh, kw = ksize
  cin, cout = w.shape[1], w.shape[2]
  w5 = w.reshape(kd, kh, kw, cin, cout)
  y = lax.conv_general_dilated(
      x, w5, window_strides=(1, 1, 1),
      padding=[(pad[0], pad[0]), (pad[1], pad[1]), (pad[2], pad[2])],
      dimension_numbers=("NDHWC", "DHWIO", "NDHWC"))
  y = y + b
  if prelu:
    y = jnp.where(y >= 0.0, y, alpha * y)
  return y


def fsrcnn_reference(layers, x_ncdhw):
  x = jnp.transpose(x_ncdhw, (0, 2, 3, 4, 1)).astype(jnp.float32)
  for lyr in layers:
    x = _conv3d_ref(x, lyr["w"], lyr["b"], lyr["alpha"],
                    lyr["ksize"], lyr["pad"], lyr["prelu"])
  return jnp.transpose(x, (0, 4, 1, 2, 3))


# ---------------------------------- main ----------------------------------- #

if __name__ == "__main__":
  root = jax.random.PRNGKey(0)
  kx, kp = jax.random.split(root)

  N, C, D, H, W = 2, 1, 4, 8, 8          # small NCDHW input, num_channels=1
  x = jax.random.normal(kx, (N, C, D, H, W), jnp.float32)
  params = init_fsrcnn_params(kp)

  out = jax.block_until_ready(fsrcnn_forward(params, x))
  assert out.shape == (N, C, D, H, W), out.shape

  ref = jax.block_until_ready(fsrcnn_reference(params, x))
  err = float(jnp.max(jnp.abs(out - ref)))
  assert err < 5e-2, f"max abs err {err}"

  print("KERNEL_OK")
</pallas_src>

<mosaic_0001>
module attributes {stable_mosaic.version = 11 : i64} {
  func.func @_matmul_bias_act_kernel(%arg0: i32, %arg1: i32, %arg2: memref<1x128x128xbf16, #tpu.memory_space<vmem>>, %arg3: memref<128x128xbf16, #tpu.memory_space<vmem>>, %arg4: memref<1x128xf32, #tpu.memory_space<vmem>>, %arg5: memref<1x128xf32, #tpu.memory_space<vmem>>, %arg6: memref<1x128x128xf32, #tpu.memory_space<vmem>>) attributes {dimension_semantics = [#tpu.dimension_semantics<parallel>, #tpu.dimension_semantics<parallel>], iteration_bounds = array<i64: 2, 2>, scalar_prefetch = 0 : i64, scratch_operands = 0 : i64, tpu.core_type = #tpu.core_type<tc>, window_params = [{transform_indices = @transform_0, window_bounds = array<i64: 1, 128, 128>}, {pipeline_mode = #tpu.pipeline_mode<synchronous>, transform_indices = @transform_1, window_bounds = array<i64: 128, 128>}, {pipeline_mode = #tpu.pipeline_mode<synchronous>, transform_indices = @transform_2, window_bounds = array<i64: 1, 128>}, {pipeline_mode = #tpu.pipeline_mode<synchronous>, transform_indices = @transform_3, window_bounds = array<i64: 1, 128>}, {transform_indices = @transform_4, window_bounds = array<i64: 1, 128, 128>}]} {
    %c0 = arith.constant 0 : index
    %c0_0 = arith.constant 0 : index
    %c0_1 = arith.constant 0 : index
    %0 = vector.load %arg2[%c0, %c0_0, %c0_1] : memref<1x128x128xbf16, #tpu.memory_space<vmem>>, vector<1x128x128xbf16>
    %1 = vector.shape_cast %0 : vector<1x128x128xbf16> to vector<128x128xbf16>
    %c0_2 = arith.constant 0 : index
    %c0_3 = arith.constant 0 : index
    %2 = vector.load %arg3[%c0_2, %c0_3] : memref<128x128xbf16, #tpu.memory_space<vmem>>, vector<128x128xbf16>
    %cst = arith.constant dense<0.000000e+00> : vector<128x128xf32>
    %3 = tpu.matmul %1, %2, %cst {dimension_numbers = #tpu.dot_dimension_numbers<[1], [0], [0], [1], [0, 0, 1, 1], [], []>} : vector<128x128xbf16>, vector<128x128xbf16>, vector<128x128xf32> -> vector<128x128xf32>
    %c0_4 = arith.constant 0 : index
    %c0_5 = arith.constant 0 : index
    %4 = vector.load %arg4[%c0_4, %c0_5] : memref<1x128xf32, #tpu.memory_space<vmem>>, vector<1x128xf32>
    %5 = vector.broadcast %4 : vector<1x128xf32> to vector<128x128xf32>
    %6 = arith.addf %3, %5 : vector<128x128xf32>
    %cst_6 = arith.constant 0.000000e+00 : f32
    %7 = vector.broadcast %cst_6 : f32 to vector<128x128xf32>
    %8 = arith.cmpf oge, %6, %7 : vector<128x128xf32>
    %c0_7 = arith.constant 0 : index
    %c0_8 = arith.constant 0 : index
    %9 = vector.load %arg5[%c0_7, %c0_8] : memref<1x128xf32, #tpu.memory_space<vmem>>, vector<1x128xf32>
    %10 = vector.broadcast %9 : vector<1x128xf32> to vector<128x128xf32>
    %11 = arith.mulf %10, %6 : vector<128x128xf32>
    %12 = arith.select %8, %6, %11 : vector<128x128xi1>, vector<128x128xf32>
    %c0_9 = arith.constant 0 : index
    %c0_10 = arith.constant 0 : index
    %c0_11 = arith.constant 0 : index
    %13 = vector.load %arg6[%c0_9, %c0_10, %c0_11] : memref<1x128x128xf32, #tpu.memory_space<vmem>>, vector<1x128x128xf32>
    %14 = vector.shape_cast %13 : vector<1x128x128xf32> to vector<128x128xf32>
    %15 = vector.shape_cast %12 : vector<128x128xf32> to vector<1x128x128xf32>
    tpu.vector_store %arg6[%c0_9, %c0_10, %c0_11], %15 {strides = array<i32>} : memref<1x128x128xf32, #tpu.memory_space<vmem>>, vector<1x128x128xf32>,
    return
  }
  func.func @transform_0(%arg0: i32, %arg1: i32) -> (i32, i32, i32) {
    %c0_i32 = arith.constant 0 : i32
    %c0_i32_0 = arith.constant 0 : i32
    return %arg0, %arg1, %c0_i32 : i32, i32, i32
  }
  func.func @transform_1(%arg0: i32, %arg1: i32) -> (i32, i32) {
    %c0_i32 = arith.constant 0 : i32
    %c0_i32_0 = arith.constant 0 : i32
    %c0_i32_1 = arith.constant 0 : i32
    return %c0_i32, %c0_i32_0 : i32, i32
  }
  func.func @transform_2(%arg0: i32, %arg1: i32) -> (i32, i32) {
    %c0_i32 = arith.constant 0 : i32
    %c0_i32_0 = arith.constant 0 : i32
    %c0_i32_1 = arith.constant 0 : i32
    return %c0_i32, %c0_i32_0 : i32, i32
  }
  func.func @transform_3(%arg0: i32, %arg1: i32) -> (i32, i32) {
    %c0_i32 = arith.constant 0 : i32
    %c0_i32_0 = arith.constant 0 : i32
    %c0_i32_1 = arith.constant 0 : i32
    return %c0_i32, %c0_i32_0 : i32, i32
  }
  func.func @transform_4(%arg0: i32, %arg1: i32) -> (i32, i32, i32) {
    %c0_i32 = arith.constant 0 : i32
    %c0_i32_0 = arith.constant 0 : i32
    return %arg0, %arg1, %c0_i32 : i32, i32, i32
  }
}

</mosaic_0001>

<bundles_post_ra>
// kernel: tpu_custom_call.1
= control target key start
LH: loop header
LB: loop body
LE: loop exit
PB: predicated region body
PF: predicated region fallthrough
CT: control target
= control target key end

     0   :  { %s1399_s0 = inlined_call_operand.hbm [shape: bf16[2,256,128], index: 0, kind: input, shape index: {}]   ;;  %s1400_s1 = inlined_call_operand.hbm [shape: bf16[128,128], index: 1, kind: input, shape index: {}]   ;;  %s1401_s2 = inlined_call_operand.vmem [shape: f32[1,128], index: 2, kind: input, shape index: {}]   ;;  %s1402_s3 = inlined_call_operand.vmem [shape: f32[1,128], index: 3, kind: input, shape index: {}]   ;;  %s1403_s4 = inlined_call_operand.hbm [shape: f32[2,256,128], index: 4, kind: output, shape index: {}]  }
   0x1   :  { %1415 = sst [smem:[#allocation16_spill]] %s1400_s1 }
   0x2   :  { %9 = vsyncpa [#allocation3], 0 }
   0x3   :  { %11 = vsyncpa [#allocation3 + $0x1], 0 }
   0x4   :  { %12 = vsyncpa [#allocation6], 0 }
   0x5   :  { %13 = vsyncpa [#allocation4], 0 }
   0x6   :  { %15 = vsyncpa [#allocation4 + $0x1], 0  ;;  %s1075_s15 = smov 0   ;;  %s1077_s16 = smov 0  }
   0x7   :  { %s1079_s17 = smov 0   ;;  %s1081_s18 = smov 0  }
   0x8   :  { %s1083_s19 = smov 0   ;;  %s1085_s20 = smov 0  }
   0x9   :  { %s1087_s21 = smov 0   ;;  %s1089_s22 = smov 0  }
   0xa LB: > { %1416 = sst [smem:[#allocation11_spill]] %s1013_s15  ;;  %s671_s23 = sadd.s32 4294967295, %s1041_s22   ;;  %s1041_s22 = sphi %s1089_s22, %s21_s22   ;;  %s1037_s21 = sphi %s1087_s21, %s1447_s21   ;;  %s1033_s20 = sphi %s1085_s20, %s1441_s20   ;;  %s1029_s19 = sphi %s1083_s19, %s1446_s19   ;;  %s1025_s18 = sphi %s1081_s18, %s1440_s18   ;;  %s1021_s17 = sphi %s1079_s17, %s1445_s17   ;;  %s1017_s16 = sphi %s1077_s16, %s1444_s16   ;;  %s1013_s15 = sphi %s1075_s15, %s1443_s15  }
   0xb   : > { %1417 = sst [smem:[#allocation12_spill]] %s1033_s20  ;;  %s672_s24 = sadd.s32 4294967294, %s1041_s22  }
   0xc   : > { %p55_p0 = scmp.ne.s32.totalorder %s1017_s16, %s1013_s15  ;;  %p1119_p1 = scmp.eq.s32.totalorder %s671_s23, 0 }
   0xd   : > { %p1123_p2 = scmp.eq.s32.totalorder %s671_s23, 3  ;;  %p150_p3 = scmp.eq.s32.totalorder %s672_s24, 3 }
   0xe   : > { %s1418_s25 = scalar_select %p1119_p1, 1, 0 }
   0xf   : > { %s1419_s26 = scalar_select %p1123_p2, 1, 0 }
  0x10   : > { %p1129_p4 = por %p1119_p1, %p55_p0  ;;  %p673_p5 = scmp.ge.s32.totalorder %s1041_s22, 1 }
  0x11   : > { %p1134_p6 = por %p150_p3, %p55_p0  ;;  %p157_p7 = scmp.lt.s32.totalorder %s1041_s22, 5 }
  0x12   : > { %s1420_s27 = scalar_select %p1129_p4, 1, 0 }
  0x13   : > { %s1421_s28 = scalar_select %p1134_p6, 1, 0 }
  0x14   : > { %p1139_p8 = pnand %p673_p5, %p157_p7  ;;  %s1043_s30 = smov [#allocation5]  }
  0x15   : > { %1422 = sst [smem:[#allocation13_spill]] %s1421_s28  ;;  %s169_s5 = sshll.u32 %s1043_s30, 4  ;;  %s170_s5 = int_to_ptr.vmem [resolvable:$true] %s169_s5 }
  0x16   : > { %s1423_s29 = scalar_select %p1139_p8, 1, 0 }
  0x17   : > { %p780_p9 = pneg %p1139_p8  ;;  %s1425_s1 = sld [smem:[#allocation16_spill]] }
  0x19   : > { %p1147_p10 = pnand %p780_p9, %p1119_p1 }
  0x1b   : > { %p883_p12 = pneg %p1147_p10 }
  0x1d   : > { %s881_s9 = scalar_lea.hbm %s1425_s1, 1024 }
  0x1e   : > { %p882_p11 = scmp.ne.s32.totalorder %s1425_s1, %s881_s9  ;;  %p888_p3 = scmp.lt.u32.totalorder %s881_s9, %s1425_s1 }
  0x20   : > { %p884_p13 = pnand %p883_p12, %p882_p11 }
  0x22   : > { %p885_p0 = pneg %p884_p13 }
  0x24   : > { %p890_p5 = pnand %p888_p3, %p885_p0 }
  0x26   : > { %893 = shalt.err (!%p890_p5)
}
  0x27   : > { %s894_s14 = scalar_lea.vmem %s170_s5, 1024  ;;  %p902_p1 = scmp.lt.s32.totalorder %s170_s5, %s170_s5 }
  0x28   : > { %p895_p7 = scmp.ne.s32.totalorder %s170_s5, %s894_s14  ;;  %p903_p4 = scmp.lt.s32.totalorder %s894_s14, %s894_s14 }
  0x2a   : > { %p897_p9 = pnand %p895_p7, %p883_p12  ;;  %p904_p8 = por %p903_p4, %p902_p1 }
  0x2c   : > { %p898_p6 = pneg %p897_p9 }
  0x2e   : > { %p905_p2 = pnand %p904_p8, %p898_p6 }
  0x30   : > { %908 = shalt.err (!%p905_p2)
}
  0x31   : > { %s1408_s23 = smov 64   ;;  %s1409_s24 = smov 4  }
  0x32   : > { %783 = dma.hbm_to_vmem [thread:$0]  (!%p1147_p10), %s1425_s1, 1024, %s170_s5, [#allocation6], %s1408_s23, %s1408_s23, %s1409_s24  }
  0x33   : > { %s30_s8 = sadd.s32 1, %s1033_s20  ;;  %s33_s9 = sadd.s32 1, %s1037_s21 }
  0x34   : > { %p31_p1 = scmp.ge.s32.totalorder %s30_s8, 2  ;;  %s42_s10 = sadd.s32 1, %s1021_s17 }
  0x35   : > { %p49_p2 = scmp.ne.s32.totalorder %s1021_s17, %s1017_s16  ;;  %p50_p4 = scmp.eq.s32.totalorder %s1041_s22, 0 }
  0x36   : > { %s1449_s8 = smov (%p31_p1, %s30_s8), 0  ;;  %s1451_s9 = smov (!%p31_p1, %s33_s9), %s1037_s21 }
  0x37   : > { %1426 = sst [smem:[#allocation14_spill]] %s1449_s8  ;;  %s38_s6 = ssub.s32 %s1033_s20, %s1449_s8 }
  0x38   : > { %p35_p6 = scmp.ge.s32.totalorder %s1451_s9, 2  ;;  %p1427_p8 = scmp.ne.s32.totalorder %s1419_s26, 0 }
  0x39   : > { %p1187_p10 = por %p50_p4, %p49_p2  ;;  %p793_p12 = scmp.lt.s32.totalorder %s1041_s22, 4 }
  0x3a   : > { %p1183_p11 = por %p1427_p8, %p49_p2  ;;  %s1453_s9 = smov (%p35_p6, %s1451_s9), 0 }
  0x3b   : > { %1430 = sst [smem:[#allocation15_spill]] %s1453_s9  ;;  %s189_s12 = sand.u32 1, %s1021_s17  }
  0x3c   : > { %s677_s13 = sshll.u32 %s1033_s20, 4  ;;  %s37_s14 = ssub.s32 %s1037_s21, %s1453_s9 }
  0x3d   : > { %s39_s30 = sor.u32 %s38_s6, %s37_s14  ;;  %s676_s7 = sshll.u32 %s189_s12, 6 }
  0x3e   : > { %p40_p13 = scmp.eq.s32.totalorder %s39_s30, 0  ;;  %s678_s26 = sshll.u32 %s1037_s21, 5 }
  0x3f   : > { %s193_s23 = scalar_lea.vmem [#allocation2], %s676_s7  ;;  %s199_s8 = sadd.s32 %s678_s26, %s677_s13 }
  0x40   : > { %s202_s24 = sshll.u32 %s193_s23, 4  ;;  %s679_s28 = sshll.u32 %s199_s8, 6  ;;  %s1202_s24 = int_to_ptr.vmem [resolvable:$true] %s202_s24 }
  0x41   : > { %s1200_s1 = scalar_select %p40_p13, %s1021_s17, %s42_s10  }
  0x42   : > { %p1208_p0 = pnand %p793_p12, %p1187_p10  ;;  %s1215_s6 = scalar_lea.hbm %s1399_s0, %s679_s28 }
  0x43   : > { %s1217_s23 = scalar_lea.sflag [#allocation3], %s189_s12  ;;  %s909_s8 = scalar_lea.hbm %s1215_s6, 1024 }
  0x44   : > { %p910_p3 = scmp.ne.s32.totalorder %s1215_s6, %s909_s8  ;;  %p911_p5 = pneg %p1208_p0 }
  0x45   : > { %s914_s9 = scalar_lea.hbm %s1399_s0, 4096  ;;  %p915_p1 = scmp.lt.u32.totalorder %s1215_s6, %s1399_s0 }
  0x46   : > { %p912_p7 = pnand %p911_p5, %p910_p3  ;;  %p916_p2 = scmp.lt.u32.totalorder %s914_s9, %s909_s8 }
  0x47   : > { %p918_p6 = scmp.lt.u32.totalorder %s909_s8, %s1215_s6 }
  0x48   : > { %p913_p9 = pneg %p912_p7  ;;  %p917_p4 = por %p916_p2, %p915_p1 }
  0x4a   : > { %p919_p8 = por %p918_p6, %p917_p4 }
  0x4c   : > { %p920_p10 = pnand %p919_p8, %p913_p9 }
  0x4e   : > { %923 = shalt.err (!%p920_p10)
}
  0x4f   : > { %s924_s12 = scalar_lea.vmem %s1202_s24, 1024  ;;  %s1046_s13 = smov [#allocation2]  }
  0x50   : > { %p925_p12 = scmp.ne.s32.totalorder %s1202_s24, %s924_s12  ;;  %s929_s14 = sshll.u32 %s1046_s13, 4  ;;  %s930_s14 = int_to_ptr.vmem [resolvable:$false] %s929_s14 }
  0x51   : > { %s931_s30 = scalar_lea.vmem %s930_s14, 2048  ;;  %p932_p7 = scmp.lt.s32.totalorder %s1202_s24, %s930_s14 }
  0x52   : > { %p927_p13 = pnand %p925_p12, %p911_p5  ;;  %p933_p1 = scmp.lt.s32.totalorder %s931_s30, %s924_s12 }
  0x54   : > { %p928_p3 = pneg %p927_p13  ;;  %p934_p2 = por %p933_p1, %p932_p7 }
  0x56   : > { %p935_p4 = pnand %p934_p2, %p928_p3 }
  0x58   : > { %938 = shalt.err (!%p935_p4)
}
  0x59   : > { %s1432_s7 = smov 4   ;;  %s1433_s26 = smov 64  }
  0x5a   : > { %787 = dma.hbm_to_vmem [thread:$0]  (!%p1208_p0), %s1215_s6, 1024, %s1202_s24, %s1217_s23, %s1433_s26, %s1433_s26, %s1432_s7  }
  0x5b   : > { %p1434_p5 = scmp.ne.s32.totalorder %s1423_s29, 0 }
  0x5c   : > { %s1251_s8 = sand.u32 (!%p1434_p5), 1, %s1017_s16   ;;  %p1435_p9 = scmp.ne.s32.totalorder (!%p1434_p5), %s1420_s27, 0 }
  0x5d   : > { %214 = sbr.rel (%p1434_p5) target bundleno = 383 (0x17f), region = 36  ;;  %s681_s10 = sshll.u32 (!%p1434_p5), %s1251_s8, 6 }
  0x5e   : > { %s217_s20 = scalar_lea.sflag (!%p1434_p5), [#allocation3], %s1251_s8  ;;  %s1255_s9 = scalar_lea.vmem (!%p1434_p5), [#allocation2], %s681_s10 }
  0x64   : > { %1000 = dma.done.wait (%p1435_p9), %s217_s20, 1024  }
  0x65   : > { %1002 = vsyncadd (%p1435_p9), %s217_s20, 4294966272  ;;  %p1436_p0 = scmp.ne.s32.totalorder %s1418_s25, 0 }
  0x67   : > { %1004 = dma.done.wait (%p1436_p0), [#allocation6], 1024  }
  0x68   : > { %1006 = vsyncadd (%p1436_p0), [#allocation6], 4294966272  ;;  %v865_v0 = vld [vmem:[#allocation5] sm:$0xff]   ;;  %v866_v1 = vld [vmem:[#allocation5 + $0x8] sm:$0xff]   ;;  %s683_s27 = sshll.u32 %s1251_s8, 7  ;;  %s703_s23 = sshll.u32 %s1025_s18, 4 }
  0x69   : > { %724 = vmatprep.subr.bf16.mxu0 %v865_v0  ;;  %756 = vmatprep.subr.bf16.mxu1 %v865_v0  ;;  %v867_v2 = vld [vmem:[#allocation5 + $0x10] sm:$0xff]   ;;  %v868_v3 = vld [vmem:[#allocation5 + $0x18] sm:$0xff]   ;;  %v873_v4 = vld [vmem:[%s1255_s9] sm:$0xff]   ;;  %s1294_s6 = scalar_lea.vmem [#allocation7], %s683_s27  ;;  %s704_s28 = sshll.u32 %s1029_s19, 5 }
  0x6a   : > { %725 = vmatpush3.bf16.msra.mxu0 %v865_v0  ;;  %764 = vmatpush3.bf16.msra.mxu1 %v865_v0  ;;  %v874_v5 = vld [vmem:[%s1255_s9 + $0x20] sm:$0xff]   ;;  %v870_v7 = vld [vmem:[#allocation5 + $0x28] sm:$0xff]   ;;  %v871_v8 = vld [vmem:[#allocation5 + $0x30] sm:$0xff]   ;;  %s1314_s18 = sadd.s32 %s704_s28, %s703_s23  ;;  %s571_s5 = sshll.u32 %s1294_s6, 4  ;;  %s1341_s5 = int_to_ptr.vmem [resolvable:$true] %s571_s5 }
  0x6b   : > { %726 = vmatprep.subr.bf16.mxu0 %v866_v1  ;;  %757 = vmatprep.subr.bf16.mxu1 %v866_v1  ;;  %v869_v6 = vld [vmem:[#allocation5 + $0x20] sm:$0xff]   ;;  %v872_v9 = vld [vmem:[#allocation5 + $0x38] sm:$0xff]   ;;  %v875_v10 = vld [vmem:[%s1255_s9 + $0x8] sm:$0xff]   ;;  %s705_s19 = sshll.u32 %s1314_s18, 7  ;;  %s556_s30 = scalar_lea.sflag [#allocation4], %s1251_s8 }
  0x6c   : > { %740 = vmatprep.mubr.bf16.mxu0 %v873_v4  ;;  %748 = vmatprep.mubr.bf16.mxu1 %v874_v5  ;;  %v876_v11 = vld [vmem:[%s1255_s9 + $0x28] sm:$0xff]   ;;  %v877_v12 = vld [vmem:[%s1255_s9 + $0x10] sm:$0xff]   ;;  %v879_v14 = vld [vmem:[%s1255_s9 + $0x18] sm:$0xff]   ;;  %s1339_s14 = scalar_lea.hbm %s1403_s4, %s705_s19  ;;  %s939_s7 = scalar_lea.vmem %s1341_s5, 2048 }
  0x6d   : > { %v878_v13 = vld [vmem:[%s1255_s9 + $0x30] sm:$0xff]   ;;  %v880_v15 = vld [vmem:[%s1255_s9 + $0x38] sm:$0xff]   ;;  %v1276_v16 = vld [vmem:[%s1401_s2] ss:$0 sm:$0xff]  ;;  %p940_p6 = scmp.ne.s32.totalorder %s1341_s5, %s939_s7  ;;  %s1047_s26 = smov [#allocation7]  }
  0x6e   : > { %727 = vmatpush3.bf16.msra.mxu0 %v866_v1  ;;  %765 = vmatpush3.bf16.msra.mxu1 %v866_v1  ;;  %v1282_v18 = vld [vmem:[%s1402_s3] ss:$0 sm:$0xff]  ;;  %s943_s10 = sshll.u32 %s1047_s26, 4  ;;  %s944_s10 = int_to_ptr.vmem [resolvable:$false] %s943_s10 }
  0x6f   : > { %728 = vmatprep.subr.bf16.mxu0 %v867_v2  ;;  %758 = vmatprep.subr.bf16.mxu1 %v867_v2  ;;  %p941_p8 = pnand %p940_p6, %p1183_p11  ;;  %s945_s20 = scalar_lea.vmem %s944_s10, 4096 }
  0x70   : > { %p946_p12 = scmp.lt.s32.totalorder %s1341_s5, %s944_s10  ;;  %p947_p13 = scmp.lt.s32.totalorder %s945_s20, %s939_s7 }
  0x71   : > { %p942_p10 = pneg %p941_p8 }
  0x72   : > { %729 = vmatpush3.bf16.msra.mxu0 %v867_v2  ;;  %766 = vmatpush3.bf16.msra.mxu1 %v867_v2  ;;  %p948_p3 = por %p947_p13, %p946_p12 }
  0x73   : > { %730 = vmatprep.subr.bf16.mxu0 %v868_v3  ;;  %759 = vmatprep.subr.bf16.mxu1 %v868_v3 }
  0x74   : > { %p949_p7 = pnand %p948_p3, %p942_p10 }
  0x76   : > { %731 = vmatpush3.bf16.msra.mxu0 %v868_v3  ;;  %767 = vmatpush3.bf16.msra.mxu1 %v868_v3 }
  0x77   : > { %732 = vmatprep.subr.bf16.mxu0 %v869_v6  ;;  %760 = vmatprep.subr.bf16.mxu1 %v869_v6 }
  0x7a   : > { %733 = vmatpush3.bf16.msra.mxu0 %v869_v6  ;;  %768 = vmatpush3.bf16.msra.mxu1 %v869_v6 }
  0x7b   : > { %734 = vmatprep.subr.bf16.mxu0 %v870_v7  ;;  %761 = vmatprep.subr.bf16.mxu1 %v870_v7 }
  0x7e   : > { %735 = vmatpush3.bf16.msra.mxu0 %v870_v7  ;;  %769 = vmatpush3.bf16.msra.mxu1 %v870_v7 }
  0x7f   : > { %736 = vmatprep.subr.bf16.mxu0 %v871_v8  ;;  %762 = vmatprep.subr.bf16.mxu1 %v871_v8 }
  0x82   : > { %737 = vmatpush3.bf16.msra.mxu0 %v871_v8  ;;  %770 = vmatpush3.bf16.msra.mxu1 %v871_v8 }
  0x83   : > { %738 = vmatprep.subr.bf16.mxu0 %v872_v9  ;;  %763 = vmatprep.subr.bf16.mxu1 %v872_v9 }
  0x86   : > { %739 = vmatpush3.bf16.msra.mxu0 %v872_v9  ;;  %771 = vmatpush3.bf16.msra.mxu1 %v872_v9 }
  0x89   : > { %741 = vmatmul.mubr.bf16.vlgmr.msra.gmra.mrb[0].mxu0 %v875_v10  ;;  %749 = vmatmul.mubr.bf16.vlgmr.msra.gmra.mrb[0].mxu1 %v876_v11 }
  0x8a   : > { %744 = vmatprep.mubr.bf16.mxu0 %v877_v12  ;;  %752 = vmatprep.mubr.bf16.mxu1 %v878_v13 }
  0x91   : > { %745 = vmatmul.mubr.bf16.gmra.mrb[4].mxu0 %v879_v14  ;;  %753 = vmatmul.mubr.bf16.gmra.mrb[4].mxu1 %v880_v15 }
 0x15c   : > { %v742_v17 = vpop.f32.mrb[0].mxu0  ;;  %v750_v19 = vpop.f32.mrb[0].mxu1 }
 0x15d   : > { %v430_v20 = vadd.f32 %v742_v17, %v1276_v16  ;;  %v462_v21 = vadd.f32 %v750_v19, %v1276_v16  ;;  %v421_v22 = vpop.f32.mrb[1].mxu0  ;;  %v453_v23 = vpop.f32.mrb[1].mxu1 }
 0x15e   : > { %v422_v24 = vadd.f32 %v1276_v16, %v421_v22  ;;  %v454_v25 = vadd.f32 %v1276_v16, %v453_v23  ;;  %v743_v26 = vpop.f32.mrb[2].mxu0  ;;  %v751_v27 = vpop.f32.mrb[2].mxu1 }
 0x15f   : > { %vm486_vm0 = vcmp.ge.f32.partialorder %v430_v20, 0.0  ;;  %v509_v28 = vmul.f32 %v1282_v18, %v430_v20  ;;  %vm494_vm1 = vcmp.ge.f32.partialorder %v462_v21, 0.0  ;;  %v517_v29 = vmul.f32 %v1282_v18, %v462_v21  ;;  %v424_v30 = vpop.f32.mrb[3].mxu0  ;;  %v456_v31 = vpop.f32.mrb[3].mxu1 }
 0x160   : > { %vm484_vm2 = vcmp.ge.f32.partialorder %v422_v24, 0.0  ;;  %v507_v32 = vmul.f32 %v1282_v18, %v422_v24  ;;  %vm492_vm3 = vcmp.ge.f32.partialorder %v454_v25, 0.0  ;;  %v515_v33 = vmul.f32 %v1282_v18, %v454_v25 }
 0x161   : > { %v525_v34 = vsel %vm486_vm0, %v430_v20, %v509_v28  ;;  %v533_v35 = vsel %vm494_vm1, %v462_v21, %v517_v29  ;;  %v433_v36 = vadd.f32 %v743_v26, %v1276_v16  ;;  %v465_v37 = vadd.f32 %v751_v27, %v1276_v16 }
 0x162   : > { %541 = vst [vmem:[%s1294_s6 + $0x10] sm:$0xff] %v525_v34  ;;  %549 = vst [vmem:[%s1294_s6 + $0x50] sm:$0xff] %v533_v35  ;;  %v523_v38 = vsel %vm484_vm2, %v422_v24, %v507_v32  ;;  %v531_v39 = vsel %vm492_vm3, %v454_v25, %v515_v33  ;;  %v425_v40 = vadd.f32 %v1276_v16, %v424_v30 }
 0x163   : > { %v457_v41 = vadd.f32 %v1276_v16, %v456_v31  ;;  %539 = vst [vmem:[%s1294_s6] sm:$0xff] %v523_v38  ;;  %547 = vst [vmem:[%s1294_s6 + $0x40] sm:$0xff] %v531_v39  ;;  %vm487_vm4 = vcmp.ge.f32.partialorder %v433_v36, 0.0  ;;  %v510_v42 = vmul.f32 %v1282_v18, %v433_v36  ;;  %vm495_vm5 = vcmp.ge.f32.partialorder %v465_v37, 0.0 }
 0x164   : > { %v518_v43 = vmul.f32 %v1282_v18, %v465_v37  ;;  %vm485_vm6 = vcmp.ge.f32.partialorder %v425_v40, 0.0  ;;  %v508_v44 = vmul.f32 %v1282_v18, %v425_v40  ;;  %v746_v46 = vpop.f32.mrb[4].mxu0  ;;  %v754_v47 = vpop.f32.mrb[4].mxu1 }
 0x165   : > { %vm493_vm7 = vcmp.ge.f32.partialorder %v457_v41, 0.0  ;;  %v516_v45 = vmul.f32 %v1282_v18, %v457_v41  ;;  %v526_v48 = vsel %vm487_vm4, %v433_v36, %v510_v42  ;;  %v446_v50 = vadd.f32 %v746_v46, %v1276_v16  ;;  %v437_v52 = vpop.f32.mrb[5].mxu0  ;;  %v469_v53 = vpop.f32.mrb[5].mxu1 }
 0x166   : > { %v534_v49 = vsel %vm495_vm5, %v465_v37, %v518_v43  ;;  %v478_v51 = vadd.f32 %v754_v47, %v1276_v16  ;;  %542 = vst [vmem:[%s1294_s6 + $0x18] sm:$0xff] %v526_v48  ;;  %v524_v54 = vsel %vm485_vm6, %v425_v40, %v508_v44  ;;  %v438_v56 = vadd.f32 %v1276_v16, %v437_v52  ;;  %v747_v58 = vpop.f32.mrb[6].mxu0  ;;  %v755_v59 = vpop.f32.mrb[6].mxu1 }
 0x167   : > { %550 = vst [vmem:[%s1294_s6 + $0x58] sm:$0xff] %v534_v49  ;;  %v532_v55 = vsel %vm493_vm7, %v457_v41, %v516_v45  ;;  %v470_v57 = vadd.f32 %v1276_v16, %v469_v53  ;;  %540 = vst [vmem:[%s1294_s6 + $0x8] sm:$0xff] %v524_v54  ;;  %vm490_vm8 = vcmp.ge.f32.partialorder %v446_v50, 0.0  ;;  %v513_v60 = vmul.f32 %v1282_v18, %v446_v50  ;;  %v440_v62 = vpop.f32.mrb[7].mxu0  ;;  %v472_v63 = vpop.f32.mrb[7].mxu1 }
 0x168   : > { %548 = vst [vmem:[%s1294_s6 + $0x48] sm:$0xff] %v532_v55  ;;  %vm498_vm9 = vcmp.ge.f32.partialorder %v478_v51, 0.0  ;;  %v521_v61 = vmul.f32 %v1282_v18, %v478_v51  ;;  %vm488_vm10 = vcmp.ge.f32.partialorder %v438_v56, 0.0  ;;  %v511_v0 = vmul.f32 %v1282_v18, %v438_v56 }
 0x169   : > { %vm496_vm11 = vcmp.ge.f32.partialorder %v470_v57, 0.0  ;;  %v519_v1 = vmul.f32 %v1282_v18, %v470_v57  ;;  %v529_v2 = vsel %vm490_vm8, %v446_v50, %v513_v60  ;;  %v449_v4 = vadd.f32 %v747_v58, %v1276_v16 }
 0x16a   : > { %v537_v3 = vsel %vm498_vm9, %v478_v51, %v521_v61  ;;  %v481_v5 = vadd.f32 %v755_v59, %v1276_v16  ;;  %545 = vst [vmem:[%s1294_s6 + $0x30] sm:$0xff] %v529_v2  ;;  %v527_v6 = vsel %vm488_vm10, %v438_v56, %v511_v0  ;;  %v441_v8 = vadd.f32 %v1276_v16, %v440_v62 }
 0x16b   : > { %553 = vst [vmem:[%s1294_s6 + $0x70] sm:$0xff] %v537_v3  ;;  %v535_v7 = vsel %vm496_vm11, %v470_v57, %v519_v1  ;;  %v473_v9 = vadd.f32 %v1276_v16, %v472_v63  ;;  %543 = vst [vmem:[%s1294_s6 + $0x20] sm:$0xff] %v527_v6  ;;  %vm491_vm12 = vcmp.ge.f32.partialorder %v449_v4, 0.0  ;;  %v514_v10 = vmul.f32 %v1282_v18, %v449_v4 }
 0x16c   : > { %551 = vst [vmem:[%s1294_s6 + $0x60] sm:$0xff] %v535_v7  ;;  %vm499_vm13 = vcmp.ge.f32.partialorder %v481_v5, 0.0  ;;  %v522_v11 = vmul.f32 %v1282_v18, %v481_v5  ;;  %vm489_vm14 = vcmp.ge.f32.partialorder %v441_v8, 0.0  ;;  %v512_v12 = vmul.f32 %v1282_v18, %v441_v8 }
 0x16d   : > { %vm497_vm15 = vcmp.ge.f32.partialorder %v473_v9, 0.0  ;;  %v520_v13 = vmul.f32 %v1282_v18, %v473_v9  ;;  %v530_v14 = vsel %vm491_vm12, %v449_v4, %v514_v10 }
 0x16e   : > { %v538_v15 = vsel %vm499_vm13, %v481_v5, %v522_v11  ;;  %546 = vst [vmem:[%s1294_s6 + $0x38] sm:$0xff] %v530_v14  ;;  %v528_v16 = vsel %vm489_vm14, %v441_v8, %v512_v12 }
 0x16f   : > { %554 = vst [vmem:[%s1294_s6 + $0x78] sm:$0xff] %v538_v15  ;;  %v536_v17 = vsel %vm497_vm15, %v473_v9, %v520_v13  ;;  %544 = vst [vmem:[%s1294_s6 + $0x28] sm:$0xff] %v528_v16 }
 0x170   : > { %552 = vst [vmem:[%s1294_s6 + $0x68] sm:$0xff] %v536_v17 }
 0x171   : > { %952 = shalt.err (!%p949_p7)
}
 0x172   : > { %s953_s9 = scalar_lea.hbm %s1339_s14, 2048  ;;  %s957_s27 = scalar_lea.hbm %s1403_s4, 8192 }
 0x173   : > { %p954_p1 = scmp.ne.s32.totalorder %s1339_s14, %s953_s9  ;;  %p958_p5 = scmp.lt.u32.totalorder %s1339_s14, %s1403_s4 }
 0x174   : > { %p959_p9 = scmp.lt.u32.totalorder %s957_s27, %s953_s9  ;;  %p961_p6 = scmp.lt.u32.totalorder %s953_s9, %s1339_s14 }
 0x175   : > { %p955_p2 = pnand %p954_p1, %p1183_p11 }
 0x176   : > { %p960_p0 = por %p959_p9, %p958_p5 }
 0x177   : > { %p956_p4 = pneg %p955_p2 }
 0x178   : > { %p962_p8 = por %p961_p6, %p960_p0 }
 0x17a   : > { %p963_p10 = pnand %p962_p8, %p956_p4 }
 0x17c   : > { %966 = shalt.err (!%p963_p10)
}
 0x17d   : > { %s1048_s6 = smov 128   ;;  %s1049_s23 = smov 8  }
 0x17e   : > { %778 = dma.vmem_to_hbm [thread:$0]  (%p1183_p11), %s1341_s5, 2048, %s1339_s14, %s556_s30, %s1048_s6, %s1048_s6, %s1049_s23  }
 0x17f PF: > { %s1437_s28 = sld [smem:[#allocation11_spill]]  ;;  %s1438_s18 = sld [smem:[#allocation13_spill]] }
 0x180   : > { %p795_p12 = scmp.ge.s32.totalorder %s1041_s22, 2 }
 0x185   : > { %s586_s19 = sand.u32 1, %s1437_s28   ;;  %p1439_p13 = scmp.ne.s32.totalorder %s1438_s18, 0 }
 0x186   : > { %s587_s12 = scalar_lea.sflag [#allocation4], %s586_s19 }
 0x187   : > { %p789_p3 = pnand %p795_p12, %p1439_p13 }
 0x189   : > { %1008 = dma.done.wait (!%p789_p3), %s587_s12, 2048  }
 0x18a   : > { %1010 = vsyncadd (!%p789_p3), %s587_s12, 4294965248  ;;  %s21_s22 = sadd.s32 1, %s1041_s22   ;;  %s1440_s18 = sld [smem:[#allocation12_spill]] }
 0x18b   : > { %p18_p7 = scmp.ge.s32.totalorder %s21_s22, 6   ;;  %s1441_s20 = sld [smem:[#allocation14_spill]] }
 0x18c   : > { %s1442_s11 = sld [smem:[#allocation15_spill]]  ;;  %s1443_s15 = smov %s1017_s16 }
 0x18d   : > { %s1444_s16 = smov %s1021_s17  ;;  %s1445_s17 = smov %s1200_s1 }
 0x18e   : > { %s1446_s19 = smov %s1037_s21  ;;  %20 = sbr.rel (!%p18_p7) target bundleno = 10 (0xa), region = 85 }
 0x192   : > { %s1447_s21 = smov %s1442_s11 }
 0x195   :  { %592 = vsyncpa [#allocation3], 1 }
 0x196   :  { %594 = vsyncpa [#allocation3 + $0x1], 1 }
 0x197   :  { %595 = vsyncpa [#allocation6], 1 }
 0x198   :  { %596 = vsyncpa [#allocation4], 1 }
 0x199   :  { %598 = vsyncpa [#allocation4 + $0x1], 1 }

</bundles_post_ra>
